<compile_context>
chip_gen: v5e
topology: v5e:2x2
jax: 0.10.0
libtpu: 0.0.40
codegen_flags: <defaults>
</compile_context>

<pallas_src>
import jax
import jax.numpy as jnp
from jax.experimental import pallas as pl
from jax.experimental.pallas import tpu as pltpu


def _round_up(x, m):
    return (x + m - 1) // m * m


def _pick_tile(n_pad, cap):
    for cand in (2048, 1024, 512, 256, 128):
        if cand <= cap and n_pad % cand == 0:
            return cand
    return 128


# -----------------------------------------------------------------------------
# Kernel: block-sparse tiled aggregation with fused normalization/bias/PReLU.
#   out[i] = prelu( dinv_row * sum_k (A+I)[i, k] @ xw[k] + b )
# grid = (row_tiles, k_slots); k walks the per-row-tile compacted list of
# nonzero adjacency tiles (scalar-prefetched table + counts).
# -----------------------------------------------------------------------------
def gcn_agg_kernel(tbl_ref, cnt_ref, adj_ref, xw_ref, dinv_ref, b_ref, a_ref,
                   out_ref):
    i = pl.program_id(0)
    k = pl.program_id(1)
    tk = adj_ref.shape[1]

    @pl.when(k == 0)
    def _():
        out_ref[...] = jnp.zeros_like(out_ref)

    # Padded slots (k >= count) repeat the previous adjacency block index, so
    # their DMA is skipped by the pipeline; guard the accumulate here.
    @pl.when(k < cnt_ref[i])
    def _():
        kk = tbl_ref[i, k]
        start = pl.multiple_of(kk * tk, tk)
        adj = adj_ref[...].astype(jnp.bfloat16)          # int8 -> bf16 (VPU)
        xw_blk = xw_ref[pl.ds(start, tk), :]             # resident xw slice
        out_ref[...] += jnp.dot(adj, xw_blk,
                                preferred_element_type=jnp.float32)

    @pl.when(k == pl.num_programs(1) - 1)
    def _():
        h = dinv_ref[...] * out_ref[...] + b_ref[...]    # f32 epilogue
        out_ref[...] = jnp.where(h > 0, h, a_ref[...] * h)   # PReLU


# -----------------------------------------------------------------------------
# Wrapper.  `structure_center` is unused by the PyTorch forward.
# -----------------------------------------------------------------------------
def encoder_forward(x, edge_index, w, b, alpha, structure_center=None):
    del structure_center                                   # unused by forward
    n, c_in = x.shape
    h = w.shape[1]

    h_pad = _round_up(h, 128)                              # lane-dense output
    n_pad = _round_up(n, 128)                              # no 512-blowup
    # >= 2 row tiles when possible so v7x's two TensorCores both get work.
    tm = _pick_tile(n_pad, min(1024, max(128, n_pad // 2)))
    tk = _pick_tile(n_pad, min(2048, n_pad))
    row_tiles = n_pad // tm
    k_tiles = n_pad // tk

    # --- adjacency (A + I), padded, int8, built in ONE scatter ---------------
    src, dst = edge_index[0], edge_index[1]
    loops = jnp.arange(n, dtype=edge_index.dtype)
    src = jnp.concatenate([src, loops])
    dst = jnp.concatenate([dst, loops])
    adj_p = jnp.zeros((n_pad, n_pad), jnp.int8).at[dst, src].add(
        jnp.ones(src.shape[0], jnp.int8))

    deg = jnp.zeros((n,), jnp.float32).at[dst].add(1.0)
    dinv = jnp.where(deg > 0, jax.lax.rsqrt(deg), 0.0)
    dinv_p = jnp.zeros((n_pad, 1), jnp.float32).at[:n, 0].set(dinv)

    # --- xw = dinv * (X @ W) in plain XLA (negligible work, O(N*H)) ----------
    w_p = jnp.zeros((c_in, h_pad), jnp.float32).at[:, :h].set(w)
    x_p = jnp.zeros((n_pad, c_in), jnp.float32).at[:n, :].set(x)
    xw = (dinv_p * (x_p @ w_p)).astype(jnp.bfloat16)

    b_p = jnp.zeros((1, h_pad), jnp.float32).at[0, :h].set(b)
    a_p = jnp.zeros((1, h_pad), jnp.float32).at[0, :h].set(alpha)

    # --- block-sparsity metadata (scalar-prefetched) --------------------------
    occ = jnp.zeros((row_tiles, k_tiles), jnp.int32).at[
        dst // tm, src // tk].add(jnp.ones(src.shape[0], jnp.int32))
    has = occ > 0
    counts = jnp.sum(has, axis=1).astype(jnp.int32)
    order = jnp.argsort(jnp.where(has, 0, 1), axis=1, stable=True).astype(jnp.int32)
    slot = jnp.arange(k_tiles, dtype=jnp.int32)[None, :]
    clipped = jnp.minimum(slot, jnp.maximum(counts - 1, 0)[:, None])
    table = jnp.take_along_axis(order, clipped, axis=1)    # pad slots = repeat

    # --- VMEM budget (explicit limit; v7x has 64 MiB physical) ---------------
    vmem_need = (2 * tm * tk                      # adjacency tile int8, 2 bufs
                 + 2 * n_pad * h_pad * 2          # resident xw bf16, 2 bufs
                 + 2 * tm * h_pad * 4             # output block f32
                 + 2 * tm * 4 + 4 * h_pad * 4 * 2)
    vmem_limit = int(min(max(32 * 1024 * 1024, vmem_need * 2),
                         48 * 1024 * 1024))

    cost = pl.CostEstimate(
        flops=2 * n_pad * n_pad * h_pad,
        transcendentals=0,
        bytes_accessed=int(n_pad * n_pad           # int8 adjacency
                           + 2 * n_pad * h_pad     # xw bf16
                           + 4 * n_pad * h_pad     # out f32
                           + 4 * n_pad),           # dinv f32
    )

    out_p = pl.pallas_call(
        gcn_agg_kernel,
        out_shape=jax.ShapeDtypeStruct((n_pad, h_pad), jnp.float32),
        grid_spec=pltpu.PrefetchScalarGridSpec(
            num_scalar_prefetch=2,
            grid=(row_tiles, k_tiles),
            in_specs=[
                pl.BlockSpec((tm, tk), lambda i, k, tbl, cnt: (i, tbl[i, k])),
                pl.BlockSpec((n_pad, h_pad), lambda i, k, tbl, cnt: (0, 0)),
                pl.BlockSpec((tm, 1), lambda i, k, tbl, cnt: (i, 0)),
                pl.BlockSpec((1, h_pad), lambda i, k, tbl, cnt: (0, 0)),
                pl.BlockSpec((1, h_pad), lambda i, k, tbl, cnt: (0, 0)),
            ],
            out_specs=pl.BlockSpec((tm, h_pad), lambda i, k, tbl, cnt: (i, 0)),
        ),
        compiler_params=pltpu.CompilerParams(
            dimension_semantics=("parallel", "arbitrary"),
            vmem_limit_bytes=vmem_limit),
        cost_estimate=cost,
    )(table, counts, adj_p, xw, dinv_p, b_p, a_p)

    return out_p[:n, :h]


if __name__ == "__main__":
    key = jax.random.PRNGKey(0)
    N, C_IN, HID, E = 16, 8, 32, 40

    k_x, k_src, k_dst, k_w = jax.random.split(key, 4)
    x = jax.random.normal(k_x, (N, C_IN), dtype=jnp.float32)
    src = jax.random.randint(k_src, (E,), 0, N, dtype=jnp.int32)
    dst = jax.random.randint(k_dst, (E,), 0, N, dtype=jnp.int32)
    edge_index = jnp.stack([src, dst])               # [2, E]

    # Deterministic parameters matching the module shapes:
    #   GCNConv weight [C_in, H] (glorot-uniform), bias [H] = 0,
    #   PReLU alpha [H] = 0.25 (PyTorch default init).
    limit = (6.0 / (C_IN + HID)) ** 0.5
    w = jax.random.uniform(k_w, (C_IN, HID), jnp.float32, -limit, limit)
    b = jnp.zeros((HID,), jnp.float32)
    alpha = jnp.full((HID,), 0.25, jnp.float32)

    out = encoder_forward(x, edge_index, w, b, alpha)
    jax.block_until_ready(out)

    # Pure-JAX f32 reference (bf16 xw/adjacency in the kernel -> loose tol).
    loops = jnp.arange(N, dtype=jnp.int32)
    s_all = jnp.concatenate([src, loops])
    d_all = jnp.concatenate([dst, loops])
    adj = jnp.zeros((N, N), jnp.float32).at[d_all, s_all].add(1.0)
    deg = jnp.zeros((N,), jnp.float32).at[d_all].add(1.0)
    dinv = 1.0 / jnp.sqrt(deg)
    a_hat = dinv[:, None] * adj * dinv[None, :]
    hh = a_hat @ (x @ w) + b
    ref = jnp.where(hh > 0, hh, alpha * hh)

    assert out.shape == (N, HID) and out.dtype == jnp.float32
    assert bool(jnp.all(jnp.isfinite(out)))
    err = float(jnp.max(jnp.abs(out - ref)))
    assert err < 5e-2, f"max abs error {err}"
    print("KERNEL_OK")
</pallas_src>

<mosaic_0001>
module attributes {stable_mosaic.version = 11 : i64} {
  func.func @gcn_agg_kernel(%arg0: i32, %arg1: i32, %arg2: memref<1x1xi32, #tpu.memory_space<smem>>, %arg3: memref<1xi32, #tpu.memory_space<smem>>, %arg4: memref<128x128xi8, #tpu.memory_space<vmem>>, %arg5: memref<128x128xbf16, #tpu.memory_space<vmem>>, %arg6: memref<128x1xf32, #tpu.memory_space<vmem>>, %arg7: memref<1x128xf32, #tpu.memory_space<vmem>>, %arg8: memref<1x128xf32, #tpu.memory_space<vmem>>, %arg9: memref<128x128xf32, #tpu.memory_space<vmem>>) attributes {dimension_semantics = [#tpu.dimension_semantics<parallel>, #tpu.dimension_semantics<arbitrary>], iteration_bounds = array<i64: 1, 1>, scalar_prefetch = 2 : i64, scratch_operands = 0 : i64, tpu.core_type = #tpu.core_type<tc>, window_params = [{transform_indices = @transform_0, window_bounds = array<i64: 128, 128>}, {pipeline_mode = #tpu.pipeline_mode<synchronous>, transform_indices = @transform_1, window_bounds = array<i64: 128, 128>}, {transform_indices = @transform_2, window_bounds = array<i64: 128, 1>}, {pipeline_mode = #tpu.pipeline_mode<synchronous>, transform_indices = @transform_3, window_bounds = array<i64: 1, 128>}, {pipeline_mode = #tpu.pipeline_mode<synchronous>, transform_indices = @transform_4, window_bounds = array<i64: 1, 128>}, {transform_indices = @transform_5, window_bounds = array<i64: 128, 128>}]} {
    %c0_i32 = arith.constant 0 : i32
    %0 = arith.cmpi eq, %arg1, %c0_i32 : i32
    %1 = arith.extui %0 : i1 to i32
    %c0_i32_0 = arith.constant 0 : i32
    %2 = arith.cmpi ne, %1, %c0_i32_0 : i32
    scf.if %2 {
      %cst = arith.constant 0.000000e+00 : f32
      %11 = vector.broadcast %cst : f32 to vector<128x128xf32>
      %c0 = arith.constant 0 : index
      %c0_4 = arith.constant 0 : index
      %12 = vector.load %arg9[%c0, %c0_4] : memref<128x128xf32, #tpu.memory_space<vmem>>, vector<128x128xf32>
      tpu.vector_store %arg9[%c0, %c0_4], %11 {strides = array<i32>} : memref<128x128xf32, #tpu.memory_space<vmem>>, vector<128x128xf32>,
    } else {
    }
    %3 = arith.index_cast %arg0 : i32 to index
    %4 = memref.load %arg3[%3] : memref<1xi32, #tpu.memory_space<smem>>
    %5 = arith.cmpi slt, %arg1, %4 : i32
    %6 = arith.extui %5 : i1 to i32
    %c0_i32_1 = arith.constant 0 : i32
    %7 = arith.cmpi ne, %6, %c0_i32_1 : i32
    scf.if %7 {
      %11 = arith.index_cast %arg0 : i32 to index
      %12 = arith.index_cast %arg1 : i32 to index
      %13 = memref.load %arg2[%11, %12] : memref<1x1xi32, #tpu.memory_space<smem>>
      %c128_i32 = arith.constant 128 : i32
      %14 = arith.muli %13, %c128_i32 : i32
      %15 = tpu.assume_multiple %14, 128 : i32
      %c0 = arith.constant 0 : index
      %c0_4 = arith.constant 0 : index
      %16 = vector.load %arg4[%c0, %c0_4] : memref<128x128xi8, #tpu.memory_space<vmem>>, vector<128x128xi8>
      %17 = arith.sitofp %16 : vector<128x128xi8> to vector<128x128xbf16>
      %18 = arith.index_cast %15 : i32 to index
      %c0_5 = arith.constant 0 : index
      %19 = vector.load %arg5[%18, %c0_5] : memref<128x128xbf16, #tpu.memory_space<vmem>>, vector<128x128xbf16>
      %c0_6 = arith.constant 0 : index
      %c0_7 = arith.constant 0 : index
      %20 = vector.load %arg9[%c0_6, %c0_7] : memref<128x128xf32, #tpu.memory_space<vmem>>, vector<128x128xf32>
      %cst = arith.constant dense<0.000000e+00> : vector<128x128xf32>
      %21 = tpu.matmul %17, %19, %cst {dimension_numbers = #tpu.dot_dimension_numbers<[1], [0], [0], [1], [0, 0, 1, 1], [], []>} : vector<128x128xbf16>, vector<128x128xbf16>, vector<128x128xf32> -> vector<128x128xf32>
      %22 = arith.addf %20, %21 : vector<128x128xf32>
      %c0_8 = arith.constant 0 : index
      %c0_9 = arith.constant 0 : index
      %23 = vector.load %arg9[%c0_8, %c0_9] : memref<128x128xf32, #tpu.memory_space<vmem>>, vector<128x128xf32>
      tpu.vector_store %arg9[%c0_8, %c0_9], %22 {strides = array<i32>} : memref<128x128xf32, #tpu.memory_space<vmem>>, vector<128x128xf32>,
    } else {
    }
    %c0_i32_2 = arith.constant 0 : i32
    %8 = arith.cmpi eq, %arg1, %c0_i32_2 : i32
    %9 = arith.extui %8 : i1 to i32
    %c0_i32_3 = arith.constant 0 : i32
    %10 = arith.cmpi ne, %9, %c0_i32_3 : i32
    scf.if %10 {
      %c0 = arith.constant 0 : index
      %c0_4 = arith.constant 0 : index
      %11 = vector.load %arg6[%c0, %c0_4] : memref<128x1xf32, #tpu.memory_space<vmem>>, vector<128x1xf32>
      %c0_5 = arith.constant 0 : index
      %c0_6 = arith.constant 0 : index
      %12 = vector.load %arg9[%c0_5, %c0_6] : memref<128x128xf32, #tpu.memory_space<vmem>>, vector<128x128xf32>
      %13 = vector.broadcast %11 : vector<128x1xf32> to vector<128x128xf32>
      %14 = arith.mulf %13, %12 : vector<128x128xf32>
      %c0_7 = arith.constant 0 : index
      %c0_8 = arith.constant 0 : index
      %15 = vector.load %arg7[%c0_7, %c0_8] : memref<1x128xf32, #tpu.memory_space<vmem>>, vector<1x128xf32>
      %16 = vector.broadcast %15 : vector<1x128xf32> to vector<128x128xf32>
      %17 = arith.addf %14, %16 : vector<128x128xf32>
      %cst = arith.constant 0.000000e+00 : f32
      %18 = vector.broadcast %cst : f32 to vector<128x128xf32>
      %19 = arith.cmpf ogt, %17, %18 : vector<128x128xf32>
      %c0_9 = arith.constant 0 : index
      %c0_10 = arith.constant 0 : index
      %20 = vector.load %arg8[%c0_9, %c0_10] : memref<1x128xf32, #tpu.memory_space<vmem>>, vector<1x128xf32>
      %21 = vector.broadcast %20 : vector<1x128xf32> to vector<128x128xf32>
      %22 = arith.mulf %21, %17 : vector<128x128xf32>
      %23 = arith.select %19, %17, %22 : vector<128x128xi1>, vector<128x128xf32>
      %c0_11 = arith.constant 0 : index
      %c0_12 = arith.constant 0 : index
      %24 = vector.load %arg9[%c0_11, %c0_12] : memref<128x128xf32, #tpu.memory_space<vmem>>, vector<128x128xf32>
      tpu.vector_store %arg9[%c0_11, %c0_12], %23 {strides = array<i32>} : memref<128x128xf32, #tpu.memory_space<vmem>>, vector<128x128xf32>,
    } else {
    }
    return
  }
  func.func @transform_0(%arg0: i32, %arg1: i32, %arg2: memref<1x1xi32, #tpu.memory_space<smem>>, %arg3: memref<1xi32, #tpu.memory_space<smem>>) -> (i32, i32) {
    %0 = arith.index_cast %arg0 : i32 to index
    %1 = arith.index_cast %arg1 : i32 to index
    %2 = memref.load %arg2[%0, %1] : memref<1x1xi32, #tpu.memory_space<smem>>
    %c0_i32 = arith.constant 0 : i32
    return %arg0, %2 : i32, i32
  }
  func.func @transform_1(%arg0: i32, %arg1: i32, %arg2: memref<1x1xi32, #tpu.memory_space<smem>>, %arg3: memref<1xi32, #tpu.memory_space<smem>>) -> (i32, i32) {
    %c0_i32 = arith.constant 0 : i32
    %c0_i32_0 = arith.constant 0 : i32
    %c0_i32_1 = arith.constant 0 : i32
    return %c0_i32, %c0_i32_0 : i32, i32
  }
  func.func @transform_2(%arg0: i32, %arg1: i32, %arg2: memref<1x1xi32, #tpu.memory_space<smem>>, %arg3: memref<1xi32, #tpu.memory_space<smem>>) -> (i32, i32) {
    %c0_i32 = arith.constant 0 : i32
    %c0_i32_0 = arith.constant 0 : i32
    return %arg0, %c0_i32 : i32, i32
  }
  func.func @transform_3(%arg0: i32, %arg1: i32, %arg2: memref<1x1xi32, #tpu.memory_space<smem>>, %arg3: memref<1xi32, #tpu.memory_space<smem>>) -> (i32, i32) {
    %c0_i32 = arith.constant 0 : i32
    %c0_i32_0 = arith.constant 0 : i32
    %c0_i32_1 = arith.constant 0 : i32
    return %c0_i32, %c0_i32_0 : i32, i32
  }
  func.func @transform_4(%arg0: i32, %arg1: i32, %arg2: memref<1x1xi32, #tpu.memory_space<smem>>, %arg3: memref<1xi32, #tpu.memory_space<smem>>) -> (i32, i32) {
    %c0_i32 = arith.constant 0 : i32
    %c0_i32_0 = arith.constant 0 : i32
    %c0_i32_1 = arith.constant 0 : i32
    return %c0_i32, %c0_i32_0 : i32, i32
  }
  func.func @transform_5(%arg0: i32, %arg1: i32, %arg2: memref<1x1xi32, #tpu.memory_space<smem>>, %arg3: memref<1xi32, #tpu.memory_space<smem>>) -> (i32, i32) {
    %c0_i32 = arith.constant 0 : i32
    %c0_i32_0 = arith.constant 0 : i32
    return %arg0, %c0_i32 : i32, i32
  }
}

</mosaic_0001>

<bundles_post_ra>
// kernel: tpu_custom_call.1
= control target key start
LH: loop header
LB: loop body
LE: loop exit
PB: predicated region body
PF: predicated region fallthrough
CT: control target
= control target key end

     0   :  { %s812_s0 = inlined_call_operand.<no memory space> [shape: s32[1,1], index: 0, kind: input, shape index: {}]   ;;  %s813_s1 = inlined_call_operand.<no memory space> [shape: s32[1], index: 1, kind: input, shape index: {}]   ;;  %s814_s2 = inlined_call_operand.vmem [shape: s8[128,128], index: 2, kind: input, shape index: {}]   ;;  %s815_s3 = inlined_call_operand.vmem [shape: bf16[128,128], index: 3, kind: input, shape index: {}]   ;;  %s816_s4 = inlined_call_operand.vmem [shape: f32[128,1], index: 4, kind: input, shape index: {}]   ;;  %s817_s5 = inlined_call_operand.vmem [shape: f32[1,128], index: 5, kind: input, shape index: {}]   ;;  %s818_s6 = inlined_call_operand.vmem [shape: f32[1,128], index: 6, kind: input, shape index: {}]   ;;  %s819_s7 = inlined_call_operand.hbm [shape: f32[128,128], index: 7, kind: output, shape index: {}]  }
   0x1   :  { %12 = sst [smem:[#allocation3]] %s812_s0 }
   0x2   :  { %14 = vsyncpa [#allocation6], 0  ;;  %s48_s26 = sld [smem:[#allocation3]]  ;;  %v646_v0 = vmov 0.0   ;;  %p543_p1 = scmp.le.s32.totalorder %s813_s1, 0 }
   0x3   :  { %61 = vst [vmem:[#allocation5] sm:$0xff] %v646_v0  ;;  %s85_s9 = sld [smem:[#allocation3]] (!%p543_p1) }
   0x4   :  { %62 = vst [vmem:[#allocation5 + $0x8] sm:$0xff] %v646_v0 }
   0x5   :  { %63 = vst [vmem:[#allocation5 + $0x10] sm:$0xff] %v646_v0 }
   0x6   :  { %64 = vst [vmem:[#allocation5 + $0x18] sm:$0xff] %v646_v0 }
   0x7   :  { %65 = vst [vmem:[#allocation5 + $0x20] sm:$0xff] %v646_v0 }
   0x8   :  { %p49_p0 = scmp.lt.s32.totalorder %s48_s26, 0  ;;  %66 = vst [vmem:[#allocation5 + $0x28] sm:$0xff] %v646_v0 }
   0x9   :  { %67 = vst [vmem:[#allocation5 + $0x30] sm:$0xff] %v646_v0  ;;  %s544_s10 = sshll.u32 (!%p543_p1), %s85_s9, 7 }
   0xa   :  { %s821_s26 = smov (!%p49_p0, %s48_s26), 0  ;;  %68 = vst [vmem:[#allocation5 + $0x38] sm:$0xff] %v646_v0  ;;  %s131_s11 = sshra.s32 (!%p543_p1), %s544_s10, 3 }
   0xb   :  { %69 = vst [vmem:[#allocation5 + $0x40] sm:$0xff] %v646_v0  ;;  %s541_s27 = sshll.u32 %s821_s26, 3  ;;  %s545_s12 = sshll.u32 (!%p543_p1), %s131_s11, 2 }
   0xc   :  { %70 = vst [vmem:[#allocation5 + $0x48] sm:$0xff] %v646_v0  ;;  %s697_s0 = scalar_lea.vmem %s814_s2, %s541_s27  ;;  %s705_s2 = scalar_lea.vmem (!%p543_p1), %s815_s3, %s545_s12 }
   0xd   :  { %71 = vst [vmem:[#allocation5 + $0x50] sm:$0xff] %v646_v0 }
   0xe   :  { %72 = vst [vmem:[#allocation5 + $0x58] sm:$0xff] %v646_v0  ;;  %81 = sbr.rel (%p543_p1) target bundleno = 212 (0xd4), region = 29 }
   0xf   :  { %73 = vst [vmem:[#allocation5 + $0x60] sm:$0xff] %v646_v0 }
  0x10   :  { %74 = vst [vmem:[#allocation5 + $0x68] sm:$0xff] %v646_v0 }
  0x11   :  { %75 = vst [vmem:[#allocation5 + $0x70] sm:$0xff] %v646_v0 }
  0x12   :  { %76 = vst [vmem:[#allocation5 + $0x78] sm:$0xff] %v646_v0 }
  0x13   :  { %v585_v1 = vld [vmem:[%s705_s2 + $0x38] sm:$0xff]  ;;  %v584_v2 = vld [vmem:[%s705_s2 + $0x30] sm:$0xff]  ;;  %v583_v3 = vld [vmem:[%s705_s2 + $0x28] sm:$0xff] }
  0x14   :  { %215 = vmatpush.bf16.msra.mxu0 %v585_v1  ;;  %586 = vmatpush.bf16.msra.mxu1 %v585_v1  ;;  %v582_v4 = vld [vmem:[%s705_s2 + $0x20] sm:$0xff]  ;;  %v581_v5 = vld [vmem:[%s705_s2 + $0x18] sm:$0xff]  ;;  %v580_v6 = vld [vmem:[%s705_s2 + $0x10] sm:$0xff] }
  0x15   :  { %587 = vmatpush.bf16.msra.mxu2 %v585_v1  ;;  %588 = vmatpush.bf16.msra.mxu3 %v585_v1  ;;  %v87_v7 = vld [vmem:[%s697_s0] sm:$0xff]  ;;  %v88_v8 = vld [vmem:[%s697_s0 + $0x8] sm:$0xff]  ;;  %v89_v9 = vld [vmem:[%s697_s0 + $0x10] sm:$0xff] }
  0x16   :  { %v90_v10 = vld [vmem:[%s697_s0 + $0x18] sm:$0xff]  ;;  %v91_v11 = vunpack.c.0.s8 %v87_v7  ;;  %v92_v12 = vunpack.c.1.s8 %v87_v7  ;;  %v95_v13 = vunpack.c.0.s8 %v88_v8  ;;  %v96_v14 = vunpack.c.1.s8 %v88_v8  ;;  %v579_v15 = vld [vmem:[%s705_s2 + $0x8] sm:$0xff]  ;;  %v578_v24 = vld [vmem:[%s705_s2] sm:$0xff] }
  0x17   :  { %v99_v16 = vunpack.c.0.s8 %v89_v9  ;;  %v100_v17 = vunpack.c.1.s8 %v89_v9  ;;  %v103_v18 = vunpack.c.0.s8 %v90_v10  ;;  %v104_v19 = vunpack.c.1.s8 %v90_v10  ;;  %v151_v53 = vld [vmem:[#allocation5] sm:$0xff]  ;;  %v152_v61 = vld [vmem:[#allocation5 + $0x8] sm:$0xff] }
  0x18   :  { %216 = vmatpush.bf16.msra.mxu0 %v584_v2  ;;  %589 = vmatpush.bf16.msra.mxu1 %v584_v2  ;;  %v107_v20 = vcvt.s32.f32 %v91_v11  ;;  %v108_v21 = vcvt.s32.f32 %v92_v12  ;;  %v111_v22 = vcvt.s32.f32 %v95_v13  ;;  %v112_v23 = vcvt.s32.f32 %v96_v14  ;;  %v155_v54 = vld [vmem:[#allocation5 + $0x20] sm:$0xff]  ;;  %v156_v62 = vld [vmem:[#allocation5 + $0x28] sm:$0xff] }
  0x19   :  { %590 = vmatpush.bf16.msra.mxu2 %v584_v2  ;;  %591 = vmatpush.bf16.msra.mxu3 %v584_v2  ;;  %v115_v25 = vcvt.s32.f32 %v99_v16  ;;  %v116_v26 = vcvt.s32.f32 %v100_v17  ;;  %v119_v27 = vcvt.s32.f32 %v103_v18  ;;  %v120_v28 = vcvt.s32.f32 %v104_v19  ;;  %v159_v59 = vld [vmem:[#allocation5 + $0x40] sm:$0xff]  ;;  %v161_v19 = vld [vmem:[#allocation5 + $0x50] sm:$0xff] }
  0x1a   :  { %v123_v29 = vpack.c.bf16 %v108_v21, %v107_v20  ;;  %v125_v30 = vpack.c.bf16 %v112_v23, %v111_v22  ;;  %v93_v33 = vunpack.c.2.s8 %v87_v7  ;;  %v94_v34 = vunpack.c.3.s8 %v87_v7  ;;  %v163_v60 = vld [vmem:[#allocation5 + $0x60] sm:$0xff]  ;;  %v160_v7 = vld [vmem:[#allocation5 + $0x48] sm:$0xff]  ;;  %v165_v20 = vld [vmem:[#allocation5 + $0x70] sm:$0xff] }
  0x1b   :  { %v127_v31 = vpack.c.bf16 %v116_v26, %v115_v25  ;;  %v129_v32 = vpack.c.bf16 %v120_v28, %v119_v27  ;;  %v97_v35 = vunpack.c.2.s8 %v88_v8  ;;  %v98_v36 = vunpack.c.3.s8 %v88_v8  ;;  %v164_v8 = vld [vmem:[#allocation5 + $0x68] sm:$0xff]  ;;  %v154_v21 = vld [vmem:[#allocation5 + $0x18] sm:$0xff] }
  0x1c   :  { %217 = vmatpush.bf16.msra.mxu0 %v583_v3  ;;  %592 = vmatpush.bf16.msra.mxu1 %v583_v3  ;;  %v101_v37 = vunpack.c.2.s8 %v89_v9  ;;  %v102_v38 = vunpack.c.3.s8 %v89_v9  ;;  %v105_v39 = vunpack.c.2.s8 %v90_v10  ;;  %v106_v40 = vunpack.c.3.s8 %v90_v10  ;;  %v153_v9 = vld [vmem:[#allocation5 + $0x10] sm:$0xff]  ;;  %v158_v22 = vld [vmem:[#allocation5 + $0x38] sm:$0xff] }
  0x1d   :  { %593 = vmatpush.bf16.msra.mxu2 %v583_v3  ;;  %594 = vmatpush.bf16.msra.mxu3 %v583_v3  ;;  %v109_v41 = vcvt.s32.f32 %v93_v33  ;;  %v110_v42 = vcvt.s32.f32 %v94_v34  ;;  %v113_v43 = vcvt.s32.f32 %v97_v35  ;;  %v114_v44 = vcvt.s32.f32 %v98_v36  ;;  %v157_v10 = vld [vmem:[#allocation5 + $0x30] sm:$0xff] }
  0x1e   :  { %v117_v45 = vcvt.s32.f32 %v101_v37  ;;  %v118_v46 = vcvt.s32.f32 %v102_v38  ;;  %v121_v47 = vcvt.s32.f32 %v105_v39  ;;  %v122_v48 = vcvt.s32.f32 %v106_v40 }
  0x1f   :  { %v124_v49 = vpack.c.bf16 %v110_v42, %v109_v41  ;;  %v126_v50 = vpack.c.bf16 %v114_v44, %v113_v43 }
  0x20   :  { %218 = vmatpush.bf16.msra.mxu0 %v582_v4  ;;  %595 = vmatpush.bf16.msra.mxu1 %v582_v4  ;;  %v128_v51 = vpack.c.bf16 %v118_v46, %v117_v45  ;;  %v130_v52 = vpack.c.bf16 %v122_v48, %v121_v47 }
  0x21   :  { %596 = vmatpush.bf16.msra.mxu2 %v582_v4  ;;  %597 = vmatpush.bf16.msra.mxu3 %v582_v4 }
  0x24   :  { %219 = vmatpush.bf16.msra.mxu0 %v581_v5  ;;  %598 = vmatpush.bf16.msra.mxu1 %v581_v5 }
  0x25   :  { %599 = vmatpush.bf16.msra.mxu2 %v581_v5  ;;  %600 = vmatpush.bf16.msra.mxu3 %v581_v5 }
  0x28   :  { %220 = vmatpush.bf16.msra.mxu0 %v580_v6  ;;  %601 = vmatpush.bf16.msra.mxu1 %v580_v6 }
  0x29   :  { %602 = vmatpush.bf16.msra.mxu2 %v580_v6  ;;  %603 = vmatpush.bf16.msra.mxu3 %v580_v6 }
  0x2c   :  { %221 = vmatpush.bf16.msra.mxu0 %v579_v15  ;;  %604 = vmatpush.bf16.msra.mxu1 %v579_v15 }
  0x2d   :  { %605 = vmatpush.bf16.msra.mxu2 %v579_v15  ;;  %606 = vmatpush.bf16.msra.mxu3 %v579_v15 }
  0x30   :  { %222 = vmatpush.bf16.msra.mxu0 %v578_v24  ;;  %607 = vmatpush.bf16.msra.mxu1 %v578_v24 }
  0x31   :  { %608 = vmatpush.bf16.msra.mxu2 %v578_v24  ;;  %609 = vmatpush.bf16.msra.mxu3 %v578_v24 }
  0x33   :  { %223 = vmatmul.bf16.vlgmr.msra.gmra.mxu0 %v123_v29  ;;  %233 = vmatmul.bf16.vlgmr.msra.gmra.mxu1 %v125_v30 }
  0x34   :  { %243 = vmatmul.bf16.vlgmr.msra.gmra.mxu2 %v127_v31  ;;  %253 = vmatmul.bf16.vlgmr.msra.gmra.mxu3 %v129_v32  ;;  %v162_v31 = vld [vmem:[#allocation5 + $0x58] sm:$0xff] }
  0x35   :  { %v166_v32 = vld [vmem:[#allocation5 + $0x78] sm:$0xff] }
  0x43   :  { %228 = vmatmul.bf16.gmra.mxu0 %v124_v49  ;;  %238 = vmatmul.bf16.gmra.mxu1 %v126_v50 }
  0x44   :  { %248 = vmatmul.bf16.gmra.mxu2 %v128_v51  ;;  %258 = vmatmul.bf16.gmra.mxu3 %v130_v52 }
  0xb0   :  { %v224_v55 = vpop.f32.mrf.mxu0  ;;  %v234_v56 = vpop.f32.mrf.mxu1 }
  0xb1   :  { %v264_v57 = vadd.f32 %v224_v55, %v151_v53  ;;  %v268_v58 = vadd.f32 %v234_v56, %v155_v54 }
  0xb3   :  { %280 = vst [vmem:[#allocation5] sm:$0xff] %v264_v57 }
  0xb4   :  { %284 = vst [vmem:[#allocation5 + $0x20] sm:$0xff] %v268_v58 }
  0xb7   :  { %v244_v63 = vpop.f32.mrf.mxu2  ;;  %v254_v0 = vpop.f32.mrf.mxu3 }
  0xb8   :  { %v272_v1 = vadd.f32 %v244_v63, %v159_v59  ;;  %v276_v2 = vadd.f32 %v254_v0, %v163_v60  ;;  %v226_v3 = vpop.f32.mrf.mxu0  ;;  %v236_v4 = vpop.f32.mrf.mxu1 }
  0xb9   :  { %v265_v5 = vadd.f32 %v226_v3, %v152_v61  ;;  %v269_v6 = vadd.f32 %v236_v4, %v156_v62 }
  0xba   :  { %288 = vst [vmem:[#allocation5 + $0x40] sm:$0xff] %v272_v1 }
  0xbb   :  { %292 = vst [vmem:[#allocation5 + $0x60] sm:$0xff] %v276_v2 }
  0xbc   :  { %281 = vst [vmem:[#allocation5 + $0x8] sm:$0xff] %v265_v5 }
  0xbd   :  { %285 = vst [vmem:[#allocation5 + $0x28] sm:$0xff] %v269_v6 }
  0xbf   :  { %v246_v11 = vpop.f32.mrf.mxu2  ;;  %v256_v12 = vpop.f32.mrf.mxu3 }
  0xc0   :  { %v273_v13 = vadd.f32 %v246_v11, %v160_v7  ;;  %v277_v14 = vadd.f32 %v256_v12, %v164_v8  ;;  %v229_v15 = vpop.f32.mrf.mxu0  ;;  %v239_v16 = vpop.f32.mrf.mxu1 }
  0xc1   :  { %v266_v17 = vadd.f32 %v229_v15, %v153_v9  ;;  %v270_v18 = vadd.f32 %v239_v16, %v157_v10 }
  0xc2   :  { %289 = vst [vmem:[#allocation5 + $0x48] sm:$0xff] %v273_v13 }
  0xc3   :  { %293 = vst [vmem:[#allocation5 + $0x68] sm:$0xff] %v277_v14 }
  0xc4   :  { %282 = vst [vmem:[#allocation5 + $0x10] sm:$0xff] %v266_v17 }
  0xc5   :  { %286 = vst [vmem:[#allocation5 + $0x30] sm:$0xff] %v270_v18 }
  0xc7   :  { %v249_v23 = vpop.f32.mrf.mxu2  ;;  %v259_v24 = vpop.f32.mrf.mxu3 }
  0xc8   :  { %v274_v25 = vadd.f32 %v249_v23, %v161_v19  ;;  %v278_v26 = vadd.f32 %v259_v24, %v165_v20  ;;  %v231_v27 = vpop.f32.mrf.mxu0  ;;  %v241_v28 = vpop.f32.mrf.mxu1 }
  0xc9   :  { %v267_v29 = vadd.f32 %v231_v27, %v154_v21  ;;  %v271_v30 = vadd.f32 %v241_v28, %v158_v22 }
  0xca   :  { %290 = vst [vmem:[#allocation5 + $0x50] sm:$0xff] %v274_v25 }
  0xcb   :  { %294 = vst [vmem:[#allocation5 + $0x70] sm:$0xff] %v278_v26 }
  0xcc   :  { %283 = vst [vmem:[#allocation5 + $0x18] sm:$0xff] %v267_v29 }
  0xcd   :  { %287 = vst [vmem:[#allocation5 + $0x38] sm:$0xff] %v271_v30 }
  0xcf   :  { %v251_v33 = vpop.f32.mrf.mxu2  ;;  %v261_v34 = vpop.f32.mrf.mxu3 }
  0xd0   :  { %v275_v35 = vadd.f32 %v251_v33, %v162_v31  ;;  %v279_v36 = vadd.f32 %v261_v34, %v166_v32 }
  0xd2   :  { %291 = vst [vmem:[#allocation5 + $0x58] sm:$0xff] %v275_v35 }
  0xd3   :  { %295 = vst [vmem:[#allocation5 + $0x78] sm:$0xff] %v279_v36 }
  0xd4 PF:  { %v303_v37 = vld [vmem:[%s816_s4 + $0x20] sm:$0xff]  ;;  %v301_v38 = vld [vmem:[%s816_s4 + $0x10] sm:$0xff]  ;;  %v647_v40 = vmov 0   ;;  %v304_v41 = vld [vmem:[%s816_s4 + $0x28] sm:$0xff]  ;;  %s521_s23 = sshll.u32 %s819_s7, 4  ;;  %s649_s24 = smov 128   ;;  %s522_s23 = int_to_ptr.hbm [resolvable:$true] %s521_s23 }
  0xd5   :  { %v299_v39 = vld [vmem:[%s816_s4] sm:$0xff]  ;;  %617 = vset.pattern.permute.xlu2 %v647_v40  ;;  %616 = vset.pattern.permute.xlu1 %v647_v40  ;;  %v302_v42 = vld [vmem:[%s816_s4 + $0x18] sm:$0xff]  ;;  %v300_v43 = vld [vmem:[%s816_s4 + $0x8] sm:$0xff]  ;;  %s650_s25 = smov 8  }
  0xd6   :  { %615 = vset.pattern.permute.xlu0 %v647_v40  ;;  %353 = vperm.xlu2 %617, %v303_v37   ;;  %v307_v44 = vld [vmem:[%s816_s4 + $0x40] sm:$0xff]  ;;  %v306_v45 = vld [vmem:[%s816_s4 + $0x38] sm:$0xff]  ;;  %v305_v46 = vld [vmem:[%s816_s4 + $0x30] sm:$0xff] }
  0xd7   :  { %343 = vperm.xlu1 %616, %v301_v38   ;;  %333 = vperm.xlu0 %615, %v299_v39   ;;  %v310_v47 = vld [vmem:[%s816_s4 + $0x58] sm:$0xff]  ;;  %v309_v48 = vld [vmem:[%s816_s4 + $0x50] sm:$0xff]  ;;  %v308_v49 = vld [vmem:[%s816_s4 + $0x48] sm:$0xff] }
  0xd8   :  { %v313_v50 = vld [vmem:[%s816_s4 + $0x70] sm:$0xff]  ;;  %v312_v51 = vld [vmem:[%s816_s4 + $0x68] sm:$0xff]  ;;  %v311_v52 = vld [vmem:[%s816_s4 + $0x60] sm:$0xff] }
  0xd9   :  { %v314_v53 = vld [vmem:[%s816_s4 + $0x78] sm:$0xff]  ;;  %v319_v54 = vld [vmem:[#allocation5 + $0x20] sm:$0xff]  ;;  %v320_v61 = vld [vmem:[#allocation5 + $0x28] sm:$0xff]  ;;  %s648_s4 = smov [#allocation5]  }
  0xda   :  { %v770_v56 = vld [vmem:[%s817_s5] ss:$0 sm:$0xff]  ;;  %v326_v9 = vld [vmem:[#allocation5 + $0x58] sm:$0xff]  ;;  %v317_v11 = vld [vmem:[#allocation5 + $0x10] sm:$0xff]  ;;  %s519_s5 = sshll.u32 %s648_s4, 4  ;;  %s520_s5 = int_to_ptr.vmem [resolvable:$true] %s519_s5 }
  0xdb   :  { %v775_v58 = vld [vmem:[%s818_s6] ss:$0 sm:$0xff]  ;;  %v329_v25 = vld [vmem:[#allocation5 + $0x70] sm:$0xff]  ;;  %v318_v27 = vld [vmem:[#allocation5 + $0x18] sm:$0xff] }
  0xdc   :  { %v323_v3 = vld [vmem:[#allocation5 + $0x40] sm:$0xff]  ;;  %v316_v28 = vld [vmem:[#allocation5 + $0x8] sm:$0xff] }
  0xdd   :  { %v315_v12 = vld [vmem:[#allocation5] sm:$0xff] }
  0xde   :  { %358 = vperm.xlu2 %617, %v304_v41  }
  0xdf   :  { %348 = vperm.xlu1 %616, %v302_v42   ;;  %338 = vperm.xlu0 %615, %v300_v43  }
  0xe6   :  { %373 = vperm.xlu2 %617, %v307_v44   ;;  %v322_v44 = vld [vmem:[#allocation5 + $0x38] sm:$0xff] }
  0xe7   :  { %368 = vperm.xlu1 %616, %v306_v45   ;;  %363 = vperm.xlu0 %615, %v305_v46   ;;  %v321_v45 = vld [vmem:[#allocation5 + $0x30] sm:$0xff] }
  0xee   :  { %388 = vperm.xlu2 %617, %v310_v47  }
  0xef   :  { %383 = vperm.xlu1 %616, %v309_v48   ;;  %378 = vperm.xlu0 %615, %v308_v49  }
  0xf6   :  { %403 = vperm.xlu2 %617, %v313_v50  }
  0xf7   :  { %398 = vperm.xlu1 %616, %v312_v51   ;;  %393 = vperm.xlu0 %615, %v311_v52  }
  0xff   :  { %408 = vperm.xlu0 %615, %v314_v53  }
 0x130   :  { %v354_v55 = vpop.permute.xlu2 %353 }
 0x131   :  { %v415_v57 = vmul.f32 %v354_v55, %v319_v54 }
 0x133   :  { %v435_v59 = vadd.f32 %v770_v56, %v415_v57  ;;  %v325_v57 = vld [vmem:[#allocation5 + $0x50] sm:$0xff] }
 0x135   :  { %vm451_vm0 = vcmp.gt.f32.partialorder %v435_v59, 0.0  ;;  %v471_v60 = vmul.f32 %v775_v58, %v435_v59 }
 0x137   :  { %v487_v62 = vsel %vm451_vm0, %v435_v59, %v471_v60  ;;  %v324_v59 = vld [vmem:[#allocation5 + $0x48] sm:$0xff] }
 0x138   :  { %503 = vst [vmem:[#allocation5 + $0x20] sm:$0xff] %v487_v62  ;;  %v359_v63 = vpop.permute.xlu2 %358 }
 0x139   :  { %v416_v0 = vmul.f32 %v359_v63, %v320_v61 }
 0x13b   :  { %v436_v1 = vadd.f32 %v770_v56, %v416_v0 }
 0x13d   :  { %vm452_vm1 = vcmp.gt.f32.partialorder %v436_v1, 0.0  ;;  %v472_v2 = vmul.f32 %v775_v58, %v436_v1 }
 0x13f   :  { %v488_v4 = vsel %vm452_vm1, %v436_v1, %v472_v2 }
 0x140   :  { %504 = vst [vmem:[#allocation5 + $0x28] sm:$0xff] %v488_v4  ;;  %v374_v5 = vpop.permute.xlu2 %373 }
 0x141   :  { %v419_v6 = vmul.f32 %v374_v5, %v323_v3 }
 0x143   :  { %v439_v7 = vadd.f32 %v770_v56, %v419_v6  ;;  %v328_v6 = vld [vmem:[#allocation5 + $0x68] sm:$0xff] }
 0x145   :  { %vm455_vm2 = vcmp.gt.f32.partialorder %v439_v7, 0.0  ;;  %v475_v8 = vmul.f32 %v775_v58, %v439_v7 }
 0x147   :  { %v491_v10 = vsel %vm455_vm2, %v439_v7, %v475_v8  ;;  %v327_v7 = vld [vmem:[#allocation5 + $0x60] sm:$0xff] }
 0x148   :  { %507 = vst [vmem:[#allocation5 + $0x40] sm:$0xff] %v491_v10  ;;  %v389_v13 = vpop.permute.xlu2 %388 }
 0x149   :  { %v422_v14 = vmul.f32 %v389_v13, %v326_v9  ;;  %v344_v15 = vpop.permute.xlu1 %343  ;;  %v334_v16 = vpop.permute.xlu0 %333 }
 0x14a   :  { %v413_v17 = vmul.f32 %v344_v15, %v317_v11  ;;  %v411_v18 = vmul.f32 %v334_v16, %v315_v12 }
 0x14b   :  { %v442_v19 = vadd.f32 %v770_v56, %v422_v14 }
 0x14c   :  { %v433_v20 = vadd.f32 %v770_v56, %v413_v17  ;;  %v431_v21 = vadd.f32 %v770_v56, %v411_v18  ;;  %v330_v18 = vld [vmem:[#allocation5 + $0x78] sm:$0xff] }
 0x14d   :  { %vm458_vm3 = vcmp.gt.f32.partialorder %v442_v19, 0.0  ;;  %v478_v22 = vmul.f32 %v775_v58, %v442_v19 }
 0x14e   :  { %vm449_vm4 = vcmp.gt.f32.partialorder %v433_v20, 0.0  ;;  %v469_v23 = vmul.f32 %v775_v58, %v433_v20  ;;  %vm447_vm5 = vcmp.gt.f32.partialorder %v431_v21, 0.0  ;;  %v467_v24 = vmul.f32 %v775_v58, %v431_v21 }
 0x14f   :  { %v494_v26 = vsel %vm458_vm3, %v442_v19, %v478_v22 }
 0x150   :  { %510 = vst [vmem:[#allocation5 + $0x58] sm:$0xff] %v494_v26  ;;  %v485_v29 = vsel %vm449_vm4, %v433_v20, %v469_v23  ;;  %v483_v30 = vsel %vm447_vm5, %v431_v21, %v467_v24  ;;  %v404_v31 = vpop.permute.xlu2 %403 }
 0x151   :  { %501 = vst [vmem:[#allocation5 + $0x10] sm:$0xff] %v485_v29  ;;  %v425_v32 = vmul.f32 %v404_v31, %v329_v25  ;;  %v349_v33 = vpop.permute.xlu1 %348  ;;  %v339_v34 = vpop.permute.xlu0 %338 }
 0x152   :  { %499 = vst [vmem:[#allocation5] sm:$0xff] %v483_v30  ;;  %v414_v35 = vmul.f32 %v349_v33, %v318_v27  ;;  %v412_v36 = vmul.f32 %v339_v34, %v316_v28 }
 0x153   :  { %v445_v37 = vadd.f32 %v770_v56, %v425_v32 }
 0x154   :  { %v434_v38 = vadd.f32 %v770_v56, %v414_v35  ;;  %v432_v39 = vadd.f32 %v770_v56, %v412_v36 }
 0x155   :  { %vm461_vm6 = vcmp.gt.f32.partialorder %v445_v37, 0.0  ;;  %v481_v40 = vmul.f32 %v775_v58, %v445_v37 }
 0x156   :  { %vm450_vm7 = vcmp.gt.f32.partialorder %v434_v38, 0.0  ;;  %v470_v41 = vmul.f32 %v775_v58, %v434_v38  ;;  %vm448_vm8 = vcmp.gt.f32.partialorder %v432_v39, 0.0  ;;  %v468_v42 = vmul.f32 %v775_v58, %v432_v39 }
 0x157   :  { %v497_v43 = vsel %vm461_vm6, %v445_v37, %v481_v40 }
 0x158   :  { %513 = vst [vmem:[#allocation5 + $0x70] sm:$0xff] %v497_v43  ;;  %v486_v46 = vsel %vm450_vm7, %v434_v38, %v470_v41  ;;  %v484_v47 = vsel %vm448_vm8, %v432_v39, %v468_v42 }
 0x159   :  { %502 = vst [vmem:[#allocation5 + $0x18] sm:$0xff] %v486_v46  ;;  %v369_v48 = vpop.permute.xlu1 %368  ;;  %v364_v49 = vpop.permute.xlu0 %363 }
 0x15a   :  { %500 = vst [vmem:[#allocation5 + $0x8] sm:$0xff] %v484_v47  ;;  %v418_v50 = vmul.f32 %v369_v48, %v322_v44  ;;  %v417_v51 = vmul.f32 %v364_v49, %v321_v45 }
 0x15c   :  { %v438_v52 = vadd.f32 %v770_v56, %v418_v50  ;;  %v437_v53 = vadd.f32 %v770_v56, %v417_v51 }
 0x15e   :  { %vm454_vm9 = vcmp.gt.f32.partialorder %v438_v52, 0.0  ;;  %v474_v54 = vmul.f32 %v775_v58, %v438_v52  ;;  %vm453_vm10 = vcmp.gt.f32.partialorder %v437_v53, 0.0  ;;  %v473_v55 = vmul.f32 %v775_v58, %v437_v53 }
 0x160   :  { %v490_v60 = vsel %vm454_vm9, %v438_v52, %v474_v54  ;;  %v489_v61 = vsel %vm453_vm10, %v437_v53, %v473_v55 }
 0x161   :  { %506 = vst [vmem:[#allocation5 + $0x38] sm:$0xff] %v490_v60  ;;  %v384_v62 = vpop.permute.xlu1 %383  ;;  %v379_v63 = vpop.permute.xlu0 %378 }
 0x162   :  { %505 = vst [vmem:[#allocation5 + $0x30] sm:$0xff] %v489_v61  ;;  %v421_v0 = vmul.f32 %v384_v62, %v325_v57  ;;  %v420_v1 = vmul.f32 %v379_v63, %v324_v59 }
 0x164   :  { %v441_v2 = vadd.f32 %v770_v56, %v421_v0  ;;  %v440_v3 = vadd.f32 %v770_v56, %v420_v1 }
 0x166   :  { %vm457_vm11 = vcmp.gt.f32.partialorder %v441_v2, 0.0  ;;  %v477_v4 = vmul.f32 %v775_v58, %v441_v2  ;;  %vm456_vm12 = vcmp.gt.f32.partialorder %v440_v3, 0.0  ;;  %v476_v5 = vmul.f32 %v775_v58, %v440_v3 }
 0x168   :  { %v493_v8 = vsel %vm457_vm11, %v441_v2, %v477_v4  ;;  %v492_v9 = vsel %vm456_vm12, %v440_v3, %v476_v5 }
 0x169   :  { %509 = vst [vmem:[#allocation5 + $0x50] sm:$0xff] %v493_v8  ;;  %v399_v10 = vpop.permute.xlu1 %398  ;;  %v394_v11 = vpop.permute.xlu0 %393 }
 0x16a   :  { %508 = vst [vmem:[#allocation5 + $0x48] sm:$0xff] %v492_v9  ;;  %v424_v12 = vmul.f32 %v399_v10, %v328_v6  ;;  %v423_v13 = vmul.f32 %v394_v11, %v327_v7 }
 0x16c   :  { %v444_v14 = vadd.f32 %v770_v56, %v424_v12  ;;  %v443_v15 = vadd.f32 %v770_v56, %v423_v13 }
 0x16e   :  { %vm460_vm13 = vcmp.gt.f32.partialorder %v444_v14, 0.0  ;;  %v480_v16 = vmul.f32 %v775_v58, %v444_v14  ;;  %vm459_vm14 = vcmp.gt.f32.partialorder %v443_v15, 0.0  ;;  %v479_v17 = vmul.f32 %v775_v58, %v443_v15 }
 0x170   :  { %v496_v19 = vsel %vm460_vm13, %v444_v14, %v480_v16  ;;  %v495_v20 = vsel %vm459_vm14, %v443_v15, %v479_v17 }
 0x171   :  { %512 = vst [vmem:[#allocation5 + $0x68] sm:$0xff] %v496_v19  ;;  %v409_v21 = vpop.permute.xlu0 %408 }
 0x172   :  { %511 = vst [vmem:[#allocation5 + $0x60] sm:$0xff] %v495_v20  ;;  %v426_v22 = vmul.f32 %v409_v21, %v330_v18 }
 0x174   :  { %v446_v23 = vadd.f32 %v770_v56, %v426_v22 }
 0x176   :  { %vm462_vm15 = vcmp.gt.f32.partialorder %v446_v23, 0.0  ;;  %v482_v24 = vmul.f32 %v775_v58, %v446_v23 }
 0x178   :  { %v498_v25 = vsel %vm462_vm15, %v446_v23, %v482_v24 }
 0x179   :  { %514 = vst [vmem:[#allocation5 + $0x78] sm:$0xff] %v498_v25 }
 0x17a   :  { %527 = dma.vmem_to_hbm [thread:$0]  %s520_s5, 2048, %s522_s23, [#allocation6], %s649_s24, %s649_s24, %s650_s25  }
 0x17b   :  { %644 = dma.done.wait [#allocation6], 2048  }
 0x17c   :  { %645 = vsyncadd [#allocation6], 4294965248 }
 0x17d   :  { %532 = vsyncpa [#allocation6], 1 }

</bundles_post_ra>
